<compile_context>
chip_gen: v7x
topology: tpu7x:2x2x1
jax: 0.10.0
libtpu: 0.0.40
codegen_flags: <defaults>
</compile_context>

<pallas_src>
import jax
import jax.numpy as jnp
from jax.experimental import pallas as pl
from jax.experimental.pallas import tpu as pltpu
import numpy as np


def _upsample2x_kernel(rw_ref, x_ref, o_ref):
    # rw_ref: (W, 2W) constant 0/1 selection matrix (resident across the grid)
    # x_ref : (TM, W)  block of input rows
    # o_ref : (TM, 4W) block of output rows: [repeat(row, 2), repeat(row, 2)]
    x = x_ref[...].astype(rw_ref.dtype)                                 # (TM, W)
    xw = jnp.dot(x, rw_ref[...], preferred_element_type=jnp.float32)   # (TM, 2W)
    xw = xw.astype(o_ref.dtype)
    # Row duplication == writing the lane-duplicated slab twice, back-to-back,
    # as one wide (4W-lane) store.
    o_ref[...] = jnp.concatenate([xw, xw], axis=-1)                     # (TM, 4W)


def _pick_row_tile(num_rows, w, itemsize):
    # Keep the output block (TM, 4W) around <= ~4 MiB so double-buffered
    # in+out blocks stay far below scoped-VMEM limits (v5e 16 MiB default,
    # v7x 64 MiB physical), while being big enough to amortize per-grid-step
    # overhead and keep DMAs long.
    budget = max(8, (4 * 1024 * 1024) // max(1, 4 * w * itemsize))
    for tm in (1024, 512, 256, 128, 64, 32, 16, 8):
        if tm <= budget and num_rows % tm == 0:
            return tm
    # Fallback: one block covering everything (block dims == full array dims).
    return num_rows


def upsample_nearest_2x(x):
    """x: (N, C, H, W) -> (N, C, 2H, 2W), nearest-neighbor, scale_factor=2."""
    N, C, H, W = x.shape
    R = N * C * H
    x2 = x.reshape(R, W)

    # 0/1 lane-replication matrix, built once (constant under jit).
    # Kept in the input dtype for floating inputs (exact selection matmul).
    mat_dtype = x.dtype if jnp.issubdtype(x.dtype, jnp.floating) else jnp.float32
    # TODO(synk): integer inputs go through an f32 selection matmul (lossy for |x| > 2^24).
    rw = (jnp.arange(W, dtype=jnp.int32)[:, None]
          == jnp.arange(2 * W, dtype=jnp.int32)[None, :] // 2).astype(mat_dtype)

    itemsize = jnp.dtype(x.dtype).itemsize
    tm = _pick_row_tile(R, W, itemsize)      # always divides R
    grid = (R // tm,)

    out2 = pl.pallas_call(
        _upsample2x_kernel,
        out_shape=jax.ShapeDtypeStruct((R, 4 * W), x.dtype),
        grid_spec=pltpu.PrefetchScalarGridSpec(
            num_scalar_prefetch=0,
            grid=grid,
            in_specs=[
                pl.BlockSpec((W, 2 * W), lambda i: (0, 0)),   # Rw: resident constant
                pl.BlockSpec((tm, W), lambda i: (i, 0)),      # input row block
            ],
            out_specs=pl.BlockSpec((tm, 4 * W), lambda i: (i, 0)),
        ),
        compiler_params=pltpu.CompilerParams(
            dimension_semantics=("parallel",)),
        cost_estimate=pl.CostEstimate(
            flops=4 * R * W * W,                       # tiny selection matmul
            transcendentals=0,
            bytes_accessed=5 * R * W * itemsize),      # 1x read + 4x write
    )(rw, x2)

    # (R, 4W) is a contiguous view of (N, C, 2H, 2W).
    return out2.reshape(N, C, 2 * H, 2 * W)


if __name__ == "__main__":
    key = jax.random.PRNGKey(0)
    # Small NCHW input consistent with the module's forward (module default is
    # (1,1,8,8); use a slightly larger batch/channel count to exercise tiling).
    x = jax.random.normal(key, (2, 4, 16, 16), dtype=jnp.float32)

    out = upsample_nearest_2x(x)
    out = jax.block_until_ready(out)

    # Reference: nearest-neighbor 2x == repeat each element 2x along H and W.
    ref = jnp.repeat(jnp.repeat(x, 2, axis=2), 2, axis=3)

    assert out.shape == (2, 4, 32, 32), out.shape
    np.testing.assert_allclose(np.asarray(out), np.asarray(ref), rtol=0, atol=0)

    print("KERNEL_OK")
</pallas_src>

<mosaic_0001>
module attributes {stable_mosaic.version = 11 : i64} {
  func.func @_upsample2x_kernel(%arg0: i32, %arg1: memref<16x32xf32, #tpu.memory_space<vmem>>, %arg2: memref<128x16xf32, #tpu.memory_space<vmem>>, %arg3: memref<128x64xf32, #tpu.memory_space<vmem>>) attributes {dimension_semantics = [#tpu.dimension_semantics<parallel>], iteration_bounds = array<i64: 1>, scalar_prefetch = 0 : i64, scratch_operands = 0 : i64, tpu.core_type = #tpu.core_type<tc>, window_params = [{pipeline_mode = #tpu.pipeline_mode<synchronous>, transform_indices = @transform_0, window_bounds = array<i64: 16, 32>}, {transform_indices = @transform_1, window_bounds = array<i64: 128, 16>}, {transform_indices = @transform_2, window_bounds = array<i64: 128, 64>}]} {
    %c0 = arith.constant 0 : index
    %c0_0 = arith.constant 0 : index
    %0 = vector.load %arg2[%c0, %c0_0] : memref<128x16xf32, #tpu.memory_space<vmem>>, vector<128x16xf32>
    %c0_1 = arith.constant 0 : index
    %c0_2 = arith.constant 0 : index
    %1 = vector.load %arg1[%c0_1, %c0_2] : memref<16x32xf32, #tpu.memory_space<vmem>>, vector<16x32xf32>
    %cst = arith.constant dense<0.000000e+00> : vector<128x32xf32>
    %2 = tpu.matmul %0, %1, %cst {dimension_numbers = #tpu.dot_dimension_numbers<[1], [0], [0], [1], [0, 0, 1, 1], [], []>} : vector<128x16xf32>, vector<16x32xf32>, vector<128x32xf32> -> vector<128x32xf32>
    %3 = tpu.concatenate %2, %2 in 1 : vector<128x32xf32>, vector<128x32xf32> -> vector<128x64xf32>
    %c0_3 = arith.constant 0 : index
    %c0_4 = arith.constant 0 : index
    %4 = vector.load %arg3[%c0_3, %c0_4] : memref<128x64xf32, #tpu.memory_space<vmem>>, vector<128x64xf32>
    tpu.vector_store %arg3[%c0_3, %c0_4], %3 {strides = array<i32>} : memref<128x64xf32, #tpu.memory_space<vmem>>, vector<128x64xf32>,
    return
  }
  func.func @transform_0(%arg0: i32) -> (i32, i32) {
    %c0_i32 = arith.constant 0 : i32
    %c0_i32_0 = arith.constant 0 : i32
    %c0_i32_1 = arith.constant 0 : i32
    return %c0_i32, %c0_i32_0 : i32, i32
  }
  func.func @transform_1(%arg0: i32) -> (i32, i32) {
    %c0_i32 = arith.constant 0 : i32
    %c0_i32_0 = arith.constant 0 : i32
    return %arg0, %c0_i32 : i32, i32
  }
  func.func @transform_2(%arg0: i32) -> (i32, i32) {
    %c0_i32 = arith.constant 0 : i32
    %c0_i32_0 = arith.constant 0 : i32
    return %arg0, %c0_i32 : i32, i32
  }
}

</mosaic_0001>

<bundles_post_ra>
// kernel: tpu_custom_call.1
= control target key start
LH: loop header
LB: loop body
LE: loop exit
PB: predicated region body
PF: predicated region fallthrough
CT: control target
= control target key end

     0   :  { %vm29_vm0 = vcmask 130048   ;;  %s394_s16 = smov 32   ;;  %vm287_vm1 = vcmask 261120   ;;  %vm304_vm2 = vcmask 523264   ;;  %s560_s0 = inlined_call_operand.vmem [shape: f32[16,32], index: 0, kind: input, shape index: {}]   ;;  %s561_s1 = inlined_call_operand.vmem [shape: f32[128,16], index: 1, kind: input, shape index: {}]   ;;  %s562_s2 = inlined_call_operand.vmem [shape: f32[128,64], index: 2, kind: output, shape index: {}]  }
   0x1   :  { %v27_v0 = vld [vmem:[%s560_s0] sm:$0xff]  ;;  %v28_v1 = vld [vmem:[%s560_s0 + $0x8] sm:$0xff]  ;;  %v13_v7 = vld [vmem:[%s561_s1 + $0x10] sm:$0xff] }
   0x2   :  { %v11_v2 = vld [vmem:[%s561_s1] sm:$0xff]  ;;  %v387_v3 = vpack.c.bf16 %v28_v1, %v27_v0  ;;  %v12_v5 = vld [vmem:[%s561_s1 + $0x8] sm:$0xff]  ;;  %v21_v8 = vld [vmem:[%s561_s1 + $0x50] sm:$0xff] }
   0x3   :  { %363 = vmatprep.mubr.msk.f32.mxu0 %vm29_vm0, %v11_v2  ;;  %v19_v4 = vld [vmem:[%s561_s1 + $0x40] sm:$0xff]  ;;  %v20_v6 = vld [vmem:[%s561_s1 + $0x48] sm:$0xff]  ;;  %v14_v9 = vld [vmem:[%s561_s1 + $0x18] sm:$0xff] }
   0x4   :  { %375 = vmatprep.mubr.msk.f32.mxu1 %vm29_vm0, %v19_v4  ;;  %388 = vmatprep.subr.bf16.mxu0 %v387_v3  ;;  %v22_v10 = vld [vmem:[%s561_s1 + $0x58] sm:$0xff]  ;;  %v15_v11 = vld [vmem:[%s561_s1 + $0x20] sm:$0xff]  ;;  %v16_v13 = vld [vmem:[%s561_s1 + $0x28] sm:$0xff] }
   0x5   :  { %391 = vmatprep.subr.bf16.mxu1 %v387_v3  ;;  %390 = vmatpush3.bf16.msra.mxu0 %v387_v3  ;;  %v23_v12 = vld [vmem:[%s561_s1 + $0x60] sm:$0xff]  ;;  %v24_v14 = vld [vmem:[%s561_s1 + $0x68] sm:$0xff]  ;;  %v17_v15 = vld [vmem:[%s561_s1 + $0x30] sm:$0xff] }
   0x6   :  { %392 = vmatpush3.bf16.msra.mxu1 %v387_v3  ;;  %v25_v16 = vld [vmem:[%s561_s1 + $0x70] sm:$0xff]  ;;  %v18_v17 = vld [vmem:[%s561_s1 + $0x38] sm:$0xff] }
   0x7   :  { %v26_v18 = vld [vmem:[%s561_s1 + $0x78] sm:$0xff] }
   0x8   :  { %364 = vmatmul.mubr.msk.f32.vlgmr.msra.gmra.mrb[0].mxu0 %vm29_vm0, %v12_v5 }
   0x9   :  { %376 = vmatmul.mubr.msk.f32.vlgmr.msra.gmra.mrb[0].mxu1 %vm29_vm0, %v20_v6  ;;  %366 = vmatprep.mubr.msk.f32.mxu0 %vm29_vm0, %v13_v7 }
   0xa   :  { %378 = vmatprep.mubr.msk.f32.mxu1 %vm29_vm0, %v21_v8 }
   0xc   :  { %367 = vmatmul.mubr.msk.f32.gmra.mrb[2].mxu0 %vm29_vm0, %v14_v9 }
   0xd   :  { %379 = vmatmul.mubr.msk.f32.gmra.mrb[2].mxu1 %vm29_vm0, %v22_v10  ;;  %369 = vmatprep.mubr.msk.f32.mxu0 %vm29_vm0, %v15_v11 }
   0xe   :  { %381 = vmatprep.mubr.msk.f32.mxu1 %vm29_vm0, %v23_v12 }
  0x10   :  { %370 = vmatmul.mubr.msk.f32.gmra.mrb[4].mxu0 %vm29_vm0, %v16_v13 }
  0x11   :  { %382 = vmatmul.mubr.msk.f32.gmra.mrb[4].mxu1 %vm29_vm0, %v24_v14  ;;  %372 = vmatprep.mubr.msk.f32.mxu0 %vm29_vm0, %v17_v15 }
  0x12   :  { %384 = vmatprep.mubr.msk.f32.mxu1 %vm29_vm0, %v25_v16 }
  0x14   :  { %373 = vmatmul.mubr.msk.f32.gmra.mrb[6].mxu0 %vm29_vm0, %v18_v17 }
  0x15   :  { %385 = vmatmul.mubr.msk.f32.gmra.mrb[6].mxu1 %vm29_vm0, %v26_v18 }
  0xdb   :  { %v365_v19 = vpop.f32.mrb[0].mxu0 }
  0xdc   :  { %v377_v20 = vpop.f32.mrb[0].mxu1  ;;  %241 = vrot.lane.b32.xlu0 %v365_v19, %s394_s16  ;;  %v144_v22 = vpop.f32.mrb[1].mxu0 }
  0xdd   :  { %257 = vrot.lane.b32.xlu1 %v377_v20, %s394_s16  ;;  %v184_v21 = vpop.f32.mrb[1].mxu1 }
  0xdf   :  { %v368_v23 = vpop.f32.mrb[2].mxu0 }
  0xe0   :  { %v380_v24 = vpop.f32.mrb[2].mxu1  ;;  %239 = vrot.lane.b32.xlu0 %v144_v22, %s394_s16  ;;  %v154_v25 = vpop.f32.mrb[3].mxu0 }
  0xe1   :  { %245 = vrot.lane.b32.xlu1 %v368_v23, %s394_s16  ;;  %v194_v26 = vpop.f32.mrb[3].mxu1 }
  0xe3   :  { %v371_v27 = vpop.f32.mrb[4].mxu0 }
  0xe4   :  { %v383_v28 = vpop.f32.mrb[4].mxu1  ;;  %255 = vrot.lane.b32.xlu0 %v184_v21, %s394_s16  ;;  %v164_v29 = vpop.f32.mrb[5].mxu0 }
  0xe5   :  { %261 = vrot.lane.b32.xlu1 %v380_v24, %s394_s16  ;;  %v204_v30 = vpop.f32.mrb[5].mxu1 }
  0xe7   :  { %v374_v31 = vpop.f32.mrb[6].mxu0 }
  0xe8   :  { %v386_v32 = vpop.f32.mrb[6].mxu1  ;;  %259 = vrot.lane.b32.xlu0 %v194_v26, %s394_s16  ;;  %v174_v33 = vpop.f32.mrb[7].mxu0 }
  0xe9   :  { %243 = vrot.lane.b32.xlu1 %v154_v25, %s394_s16  ;;  %v214_v34 = vpop.f32.mrb[7].mxu1 }
  0xec   :  { %247 = vrot.lane.b32.xlu0 %v164_v29, %s394_s16 }
  0xed   :  { %249 = vrot.lane.b32.xlu1 %v371_v27, %s394_s16 }
  0xf0   :  { %263 = vrot.lane.b32.xlu0 %v204_v30, %s394_s16 }
  0xf1   :  { %265 = vrot.lane.b32.xlu1 %v383_v28, %s394_s16 }
  0xf4   :  { %251 = vrot.lane.b32.xlu0 %v174_v33, %s394_s16 }
  0xf5   :  { %253 = vrot.lane.b32.xlu1 %v374_v31, %s394_s16 }
  0xf8   :  { %267 = vrot.lane.b32.xlu0 %v214_v34, %s394_s16 }
  0xf9   :  { %269 = vrot.lane.b32.xlu1 %v386_v32, %s394_s16 }
 0x14e   :  { %v242_v36 = vpop.permute.xlu0 %241 }
 0x14f   :  { %v258_v35 = vpop.permute.xlu1 %257  ;;  %v289_v38 = vsel %vm287_vm1, %v365_v19, %v242_v36 }
 0x150   :  { %v297_v37 = vsel %vm287_vm1, %v377_v20, %v258_v35  ;;  %306 = vst.msk [vmem:[%s562_s2 + $0x8] sm:$0xff] %vm304_vm2, %v289_v38 }
 0x151   :  { %314 = vst.msk [vmem:[%s562_s2 + $0x48] sm:$0xff] %vm304_vm2, %v297_v37 }
 0x152   :  { %v240_v39 = vpop.permute.xlu0 %239 }
 0x153   :  { %v246_v40 = vpop.permute.xlu1 %245  ;;  %v288_v41 = vsel %vm287_vm1, %v144_v22, %v240_v39 }
 0x154   :  { %v291_v42 = vsel %vm287_vm1, %v368_v23, %v246_v40  ;;  %305 = vst.msk [vmem:[%s562_s2] sm:$0xff] %vm304_vm2, %v288_v41 }
 0x155   :  { %308 = vst.msk [vmem:[%s562_s2 + $0x18] sm:$0xff] %vm304_vm2, %v291_v42 }
 0x156   :  { %v256_v43 = vpop.permute.xlu0 %255 }
 0x157   :  { %v262_v44 = vpop.permute.xlu1 %261  ;;  %v296_v45 = vsel %vm287_vm1, %v184_v21, %v256_v43 }
 0x158   :  { %v299_v46 = vsel %vm287_vm1, %v380_v24, %v262_v44  ;;  %313 = vst.msk [vmem:[%s562_s2 + $0x40] sm:$0xff] %vm304_vm2, %v296_v45 }
 0x159   :  { %316 = vst.msk [vmem:[%s562_s2 + $0x58] sm:$0xff] %vm304_vm2, %v299_v46 }
 0x15a   :  { %v260_v47 = vpop.permute.xlu0 %259 }
 0x15b   :  { %v244_v48 = vpop.permute.xlu1 %243  ;;  %v298_v49 = vsel %vm287_vm1, %v194_v26, %v260_v47 }
 0x15c   :  { %v290_v50 = vsel %vm287_vm1, %v154_v25, %v244_v48  ;;  %315 = vst.msk [vmem:[%s562_s2 + $0x50] sm:$0xff] %vm304_vm2, %v298_v49 }
 0x15d   :  { %307 = vst.msk [vmem:[%s562_s2 + $0x10] sm:$0xff] %vm304_vm2, %v290_v50 }
 0x15e   :  { %v248_v52 = vpop.permute.xlu0 %247 }
 0x15f   :  { %v250_v51 = vpop.permute.xlu1 %249  ;;  %v292_v54 = vsel %vm287_vm1, %v164_v29, %v248_v52 }
 0x160   :  { %v293_v53 = vsel %vm287_vm1, %v371_v27, %v250_v51  ;;  %309 = vst.msk [vmem:[%s562_s2 + $0x20] sm:$0xff] %vm304_vm2, %v292_v54 }
 0x161   :  { %310 = vst.msk [vmem:[%s562_s2 + $0x28] sm:$0xff] %vm304_vm2, %v293_v53 }
 0x162   :  { %v264_v56 = vpop.permute.xlu0 %263 }
 0x163   :  { %v266_v55 = vpop.permute.xlu1 %265  ;;  %v300_v58 = vsel %vm287_vm1, %v204_v30, %v264_v56 }
 0x164   :  { %v301_v57 = vsel %vm287_vm1, %v383_v28, %v266_v55  ;;  %317 = vst.msk [vmem:[%s562_s2 + $0x60] sm:$0xff] %vm304_vm2, %v300_v58 }
 0x165   :  { %318 = vst.msk [vmem:[%s562_s2 + $0x68] sm:$0xff] %vm304_vm2, %v301_v57 }
 0x166   :  { %v252_v60 = vpop.permute.xlu0 %251 }
 0x167   :  { %v254_v59 = vpop.permute.xlu1 %253  ;;  %v294_v62 = vsel %vm287_vm1, %v174_v33, %v252_v60 }
 0x168   :  { %v295_v61 = vsel %vm287_vm1, %v374_v31, %v254_v59  ;;  %311 = vst.msk [vmem:[%s562_s2 + $0x30] sm:$0xff] %vm304_vm2, %v294_v62 }
 0x169   :  { %312 = vst.msk [vmem:[%s562_s2 + $0x38] sm:$0xff] %vm304_vm2, %v295_v61 }
 0x16a   :  { %v268_v0 = vpop.permute.xlu0 %267 }
 0x16b   :  { %v270_v63 = vpop.permute.xlu1 %269  ;;  %v302_v2 = vsel %vm287_vm1, %v214_v34, %v268_v0 }
 0x16c   :  { %v303_v1 = vsel %vm287_vm1, %v386_v32, %v270_v63  ;;  %319 = vst.msk [vmem:[%s562_s2 + $0x70] sm:$0xff] %vm304_vm2, %v302_v2 }
 0x16d   :  { %320 = vst.msk [vmem:[%s562_s2 + $0x78] sm:$0xff] %vm304_vm2, %v303_v1 }

</bundles_post_ra>
